<compile_context>
chip_gen: v7x
topology: tpu7x:2x2x1
jax: 0.10.0
libtpu: 0.0.40
codegen_flags: <defaults>
</compile_context>

<pallas_src>
import math
import numpy as np
import jax
import jax.numpy as jnp
from jax import lax
from jax.experimental import pallas as pl
from jax.experimental.pallas import tpu as pltpu


# ----------------------------- helpers --------------------------------------

def _round_up(x, m):
    return ((x + m - 1) // m) * m


def _nbytes(shape, dtype):
    return int(np.prod(shape)) * jnp.dtype(dtype).itemsize


def _vmem_capacity_bytes():
    try:
        return int(pltpu.get_tpu_info().vmem_capacity_bytes)
    except Exception:
        return 64 * 1024 * 1024  # conservative default (v7x per-TC physical)


def _pick_row_tile(bn, cap):
    """Balanced row tile: smallest multiple of 8 giving <= cap rows per tile."""
    n_tiles = max(1, math.ceil(bn / cap))
    return _round_up(math.ceil(bn / n_tiles), 8)


def _pick_e_tile(e_pad, cap):
    """Largest lane-dense E tile (multiple of 128, <= cap) dividing e_pad."""
    for te in (4096, 2048, 1024, 512, 256, 128):
        if te <= cap and e_pad % te == 0:
            return te
    return 128  # unreachable: e_pad is always a multiple of 128


# ----------------------------- Pallas kernel --------------------------------

def _text_embs_kernel(first_ref, ids_ref, wp_ref, bp_ref, we_ref, pos_ref, out_ref):
    """One (E-tile e, row-tile r) grid step (grid = (E tiles, row tiles)).

    first_ref: (TM, Ht)     bf16 -- hidden_states[:, 0] rows for this row tile
    ids_ref:   (TM, 1)      int32 -- position id per row (one per neighbor)
    wp_ref:    (Ht, Ht)     bf16 -- TextPooler.dense weight (constant index_map)
    bp_ref:    (1, Ht)      f32  -- TextPooler.dense bias   (constant index_map)
    we_ref:    (Ht, TE)     bf16 -- text_embeddings weight, E-tile slab
    pos_ref:   (P_pad, TE)  bf16 -- (text_position_embeddings + b_emb) E-tile slab
    out_ref:   (TM, TE)     bf16
    """
    # Pooler (small matmul, recomputed per E tile; hidden under the w_emb stream).
    pooled = jnp.tanh(
        jnp.dot(first_ref[...], wp_ref[...], preferred_element_type=jnp.float32)
        + bp_ref[...]
    )

    # Main projection, f32 accumulate on the MXU with bf16 feeds.
    embs = jnp.dot(pooled.astype(we_ref.dtype), we_ref[...],
                   preferred_element_type=jnp.float32)

    # In-VMEM position-embedding gather as an exact one-hot MXU matmul
    # (avoids materializing (BN, E) pos rows in HBM).
    tm = ids_ref.shape[0]
    p = pos_ref.shape[0]
    onehot = (ids_ref[...] ==
              lax.broadcasted_iota(jnp.int32, (tm, p), 1)).astype(pos_ref.dtype)
    pos_rows = jnp.dot(onehot, pos_ref[...], preferred_element_type=jnp.float32)

    out_ref[...] = (embs + pos_rows).astype(out_ref.dtype)


def text_neighbor_embeddings(first_tok, pos_ids, w_pool_bf, b_pool, w_emb_bf,
                             pos_table_bf, *, out_cols=None):
    """Fused TextPooler + text_embeddings + position-embedding add.

    first_tok:    (BN, Ht)        f32/bf16 -- hidden_states[:, 0] of the text encoder
    pos_ids:      (BN,)           int32    -- one position id per neighbor
    w_pool_bf:    (Ht, Ht) bf16,  b_pool: (1, Ht) f32
    w_emb_bf:     (Ht, E_pad)     bf16  (columns padded to a multiple of 128)
    pos_table_bf: (P_pad, E_pad)  bf16  (b_emb folded in, rows padded to mult of 8)
    returns:      (BN, out_cols)  bf16
    """
    BN, Ht = first_tok.shape
    E_pad = w_emb_bf.shape[1]
    P_pad = pos_table_bf.shape[0]
    out_cols = E_pad if out_cols is None else out_cols

    vmem_cap = _vmem_capacity_bytes()
    big_vmem = vmem_cap >= 100 * 1024 * 1024          # v5e / v6e (128 MiB physical)
    row_cap = 512 if big_vmem else 256
    te_cap = 4096 if big_vmem else 2048               # v7x stays conservative

    tm = _pick_row_tile(BN, row_cap)
    bn_pad = _round_up(BN, tm)
    te = _pick_e_tile(E_pad, te_cap)

    first_bf = first_tok.astype(jnp.bfloat16)
    ids = pos_ids.reshape(BN, 1).astype(jnp.int32)
    if bn_pad != BN:                                   # only the small inputs are padded
        pad = bn_pad - BN
        first_bf = jnp.pad(first_bf, ((0, pad), (0, 0)))
        ids = jnp.pad(ids, ((0, pad), (0, 0)))

    grid = (E_pad // te, bn_pad // tm)                 # E outer, rows inner

    # Explicit scoped-VMEM budget from the actual tile footprint (double-buffered).
    est = (
        2 * _nbytes((tm, Ht), jnp.bfloat16)
        + 2 * _nbytes((tm, 1), jnp.int32)
        + 2 * _nbytes((Ht, Ht), jnp.bfloat16)
        + 2 * _nbytes((1, Ht), jnp.float32)
        + 2 * _nbytes((Ht, te), jnp.bfloat16)
        + 2 * _nbytes((P_pad, te), jnp.bfloat16)
        + 2 * _nbytes((tm, te), jnp.bfloat16)
    )
    vmem_limit = max(32 * 1024 * 1024, int(est * 1.5))

    out = pl.pallas_call(
        _text_embs_kernel,
        out_shape=jax.ShapeDtypeStruct((bn_pad, E_pad), jnp.bfloat16),
        grid_spec=pltpu.PrefetchScalarGridSpec(
            num_scalar_prefetch=0,
            grid=grid,
            in_specs=[
                pl.BlockSpec((tm, Ht), lambda e, r: (r, 0)),      # first-token rows
                pl.BlockSpec((tm, 1), lambda e, r: (r, 0)),       # position ids
                pl.BlockSpec((Ht, Ht), lambda e, r: (0, 0)),      # pooler W (resident)
                pl.BlockSpec((1, Ht), lambda e, r: (0, 0)),       # pooler b (resident)
                pl.BlockSpec((Ht, te), lambda e, r: (0, e)),      # emb W, E-tiled
                pl.BlockSpec((P_pad, te), lambda e, r: (0, e)),   # pos table, E-tiled
            ],
            out_specs=pl.BlockSpec((tm, te), lambda e, r: (r, e)),
        ),
        compiler_params=pltpu.CompilerParams(
            dimension_semantics=("parallel", "parallel"),
            vmem_limit_bytes=vmem_limit,
        ),
    )(first_bf, ids, w_pool_bf, b_pool, w_emb_bf, pos_table_bf)

    return out[:BN, :out_cols]


# ------------------------- model wrapper (glue) ------------------------------

class SelfAttentionModelPallas:
    """neighbor_mode='embedding', context in ('session','text_only'), decoder_only=True."""

    def __init__(self, key, *, vocab_size, lm_hidden, text_hidden,
                 n_text_tokens, max_output_length):
        self.n_text_tokens = n_text_tokens
        self.lm_hidden = lm_hidden
        E = lm_hidden * n_text_tokens
        self.E = E
        ks = jax.random.split(key, 6)
        scale = 0.02
        # LM input embedding table (stand-in for self.input_embeddings).
        self.input_embedding_table = scale * jax.random.normal(
            ks[0], (vocab_size, lm_hidden), jnp.float32)
        # TextPooler.dense
        self.w_pool = scale * jax.random.normal(ks[1], (text_hidden, text_hidden), jnp.float32)
        self.b_pool = scale * jax.random.normal(ks[2], (1, text_hidden), jnp.float32)
        # self.text_embeddings: Linear(text_hidden -> n_text_tokens * lm_hidden)
        self.w_emb = scale * jax.random.normal(ks[3], (text_hidden, E), jnp.float32)
        self.b_emb = scale * jax.random.normal(ks[4], (1, E), jnp.float32)
        # self.text_position_embeddings: Embedding(max_output_length + 1, E)
        self.pos_table = scale * jax.random.normal(
            ks[5], (max_output_length + 1, E), jnp.float32)

        # Pre-cast MXU weights to bf16, fold b_emb into the position table
        # (embs + b_emb + pos_table[id] == embs + (pos_table + b_emb)[id]),
        # and pad columns to a multiple of 128 (guaranteed lane-dense E tile)
        # and table rows to a multiple of 8 (layout friendliness). Done once.
        self.w_pool_bf = self.w_pool.astype(jnp.bfloat16)
        e_pad = _round_up(E, 128)
        p = max_output_length + 1
        p_pad = _round_up(p, 8)
        w_emb_bf = self.w_emb.astype(jnp.bfloat16)
        pos_fused = (self.pos_table + self.b_emb).astype(jnp.bfloat16)
        if e_pad != E:
            w_emb_bf = jnp.pad(w_emb_bf, ((0, 0), (0, e_pad - E)))
            pos_fused = jnp.pad(pos_fused, ((0, 0), (0, e_pad - E)))
        if p_pad != p:
            pos_fused = jnp.pad(pos_fused, ((0, p_pad - p), (0, 0)))
        self.w_emb_bf = w_emb_bf
        self.pos_table_fused_bf = pos_fused

    def get_text_embs(self, text_hidden_states, pos_ids):
        """text_hidden_states: (B, N, S, Ht) output of the frozen text encoder.
        pos_ids: (B, N) int32 -- one position id per neighbor (the shape required
        by the broadcast in the PyTorch position add and the mask concat).
        Returns (B, N, n_text_tokens, lm_hidden) bf16."""
        B, N, S, Ht = text_hidden_states.shape
        first_tok = text_hidden_states[:, :, 0, :].reshape(B * N, Ht)
        embs = text_neighbor_embeddings(
            first_tok, pos_ids.reshape(B * N),
            self.w_pool_bf, self.b_pool, self.w_emb_bf, self.pos_table_fused_bf,
            out_cols=self.E)
        return embs.reshape(B, N, self.n_text_tokens, self.lm_hidden)

    def forward(self, input_ids, attention_mask, labels,
                neighbor_input_ids, neighbor_attention_mask, neighbor_pos_ids,
                text_hidden_states):
        B, N, S = neighbor_input_ids.shape
        # Neighbor text embeddings (Pallas-fused hot path).
        neighbor_embeds = self.get_text_embs(text_hidden_states, neighbor_pos_ids)
        neighbor_embeds = neighbor_embeds.reshape(B, N * self.n_text_tokens, -1)
        # neighbor_attention_mask = (neighbor_pos_ids > 0), repeat_interleave on dim=1.
        nbr_mask = (neighbor_pos_ids > 0)                                     # (B, N)
        nbr_mask = jnp.repeat(nbr_mask, self.n_text_tokens, axis=1)           # (B, N*T)
        # Input token embeddings + concat of neighbor embeddings.
        input_embs = self.input_embedding_table[input_ids]                    # (B, L, H)
        input_embs = jnp.concatenate(
            [input_embs, neighbor_embeds.astype(input_embs.dtype)], axis=1)
        attention_mask = jnp.concatenate(
            [attention_mask, nbr_mask.astype(attention_mask.dtype)], axis=1)
        # decoder_only: pad labels with -100 for the neighbor tokens.
        neighbor_labels = jnp.full((B, N * self.n_text_tokens), -100, labels.dtype)
        labels = jnp.concatenate([labels, neighbor_labels], axis=1)
        # TODO(synk): the wrapped pretrained LM call self.lm(input_embs, ...) is an
        # external model with no Pallas equivalent here; return its prepared inputs.
        return input_embs, attention_mask, labels


# --------------------------- pure-JAX reference ------------------------------

def reference_text_embs(model, text_hidden_states, pos_ids):
    """Plain-JAX reference with the same numerics (bf16 feeds, f32 accumulate,
    bf16 output) as the fused kernel."""
    B, N, S, Ht = text_hidden_states.shape
    first = text_hidden_states[:, :, 0, :].reshape(B * N, Ht).astype(jnp.bfloat16)
    pooled = jnp.tanh(
        jnp.dot(first, model.w_pool_bf, preferred_element_type=jnp.float32)
        + model.b_pool)
    pos_rows = model.pos_table_fused_bf[pos_ids.reshape(B * N), :model.E]
    embs = jnp.dot(pooled.astype(jnp.bfloat16), model.w_emb_bf[:, :model.E],
                   preferred_element_type=jnp.float32) + pos_rows.astype(jnp.float32)
    embs = embs.astype(jnp.bfloat16)
    return embs.reshape(B, N, model.n_text_tokens, model.lm_hidden)


# --------------------------------- main --------------------------------------

if __name__ == "__main__":
    B, N, S, L = 2, 3, 8, 8          # batch, text neighbors, neighbor seq, input seq
    H_LM, H_TXT = 128, 128           # lm embedding dim, text-encoder hidden
    N_TEXT_TOKENS = 4                # E = 512 (lane-dense multiple of 128)
    MAX_OUT = 16
    VOCAB = 64

    key = jax.random.PRNGKey(0)
    model_key, data_key = jax.random.split(key)
    model = SelfAttentionModelPallas(
        model_key, vocab_size=VOCAB, lm_hidden=H_LM, text_hidden=H_TXT,
        n_text_tokens=N_TEXT_TOKENS, max_output_length=MAX_OUT)

    ks = jax.random.split(data_key, 5)
    input_ids = jax.random.randint(ks[0], (B, L), 0, VOCAB)
    attention_mask = jnp.ones((B, L), jnp.int32)
    labels = jax.random.randint(ks[1], (B, L), 0, VOCAB)
    neighbor_input_ids = jax.random.randint(ks[2], (B, N, S), 0, VOCAB)
    neighbor_attention_mask = jnp.ones((B, N, S), jnp.int32)
    neighbor_pos_ids = jax.random.randint(ks[3], (B, N), 0, MAX_OUT + 1)
    # Stand-in for the frozen RoBERTa text encoder's last_hidden_state.
    text_hidden_states = jax.random.normal(ks[4], (B, N, S, H_TXT), jnp.float32)

    input_embs, attn_mask, out_labels = model.forward(
        input_ids, attention_mask, labels,
        neighbor_input_ids, neighbor_attention_mask, neighbor_pos_ids,
        text_hidden_states)
    jax.block_until_ready((input_embs, attn_mask, out_labels))

    # Numerical check of the fused kernel against a plain-JAX reference.
    got = model.get_text_embs(text_hidden_states, neighbor_pos_ids).astype(jnp.float32)
    want = reference_text_embs(model, text_hidden_states, neighbor_pos_ids).astype(jnp.float32)
    err = float(jnp.max(jnp.abs(got - want)))
    assert err < 1e-2, f"kernel mismatch, max abs err={err}"

    assert input_embs.shape == (B, L + N * N_TEXT_TOKENS, H_LM)
    assert attn_mask.shape == (B, L + N * N_TEXT_TOKENS)
    assert out_labels.shape == (B, L + N * N_TEXT_TOKENS)
    print("KERNEL_OK")
</pallas_src>

<mosaic_0001>
module attributes {stable_mosaic.version = 11 : i64} {
  func.func @_text_embs_kernel(%arg0: i32, %arg1: i32, %arg2: memref<8x128xbf16, #tpu.memory_space<vmem>>, %arg3: memref<8x1xi32, #tpu.memory_space<vmem>>, %arg4: memref<128x128xbf16, #tpu.memory_space<vmem>>, %arg5: memref<1x128xf32, #tpu.memory_space<vmem>>, %arg6: memref<128x512xbf16, #tpu.memory_space<vmem>>, %arg7: memref<24x512xbf16, #tpu.memory_space<vmem>>, %arg8: memref<8x512xbf16, #tpu.memory_space<vmem>>) attributes {dimension_semantics = [#tpu.dimension_semantics<parallel>, #tpu.dimension_semantics<parallel>], iteration_bounds = array<i64: 1, 1>, scalar_prefetch = 0 : i64, scratch_operands = 0 : i64, tpu.core_type = #tpu.core_type<tc>, window_params = [{transform_indices = @transform_0, window_bounds = array<i64: 8, 128>}, {transform_indices = @transform_1, window_bounds = array<i64: 8, 1>}, {pipeline_mode = #tpu.pipeline_mode<synchronous>, transform_indices = @transform_2, window_bounds = array<i64: 128, 128>}, {pipeline_mode = #tpu.pipeline_mode<synchronous>, transform_indices = @transform_3, window_bounds = array<i64: 1, 128>}, {transform_indices = @transform_4, window_bounds = array<i64: 128, 512>}, {transform_indices = @transform_5, window_bounds = array<i64: 24, 512>}, {transform_indices = @transform_6, window_bounds = array<i64: 8, 512>}]} {
    %c0 = arith.constant 0 : index
    %c0_0 = arith.constant 0 : index
    %0 = vector.load %arg2[%c0, %c0_0] : memref<8x128xbf16, #tpu.memory_space<vmem>>, vector<8x128xbf16>
    %c0_1 = arith.constant 0 : index
    %c0_2 = arith.constant 0 : index
    %1 = vector.load %arg4[%c0_1, %c0_2] : memref<128x128xbf16, #tpu.memory_space<vmem>>, vector<128x128xbf16>
    %cst = arith.constant dense<0.000000e+00> : vector<8x128xf32>
    %2 = tpu.matmul %0, %1, %cst {dimension_numbers = #tpu.dot_dimension_numbers<[1], [0], [0], [1], [0, 0, 1, 1], [], []>} : vector<8x128xbf16>, vector<128x128xbf16>, vector<8x128xf32> -> vector<8x128xf32>
    %c0_3 = arith.constant 0 : index
    %c0_4 = arith.constant 0 : index
    %3 = vector.load %arg5[%c0_3, %c0_4] : memref<1x128xf32, #tpu.memory_space<vmem>>, vector<1x128xf32>
    %4 = vector.broadcast %3 : vector<1x128xf32> to vector<8x128xf32>
    %5 = arith.addf %2, %4 : vector<8x128xf32>
    %6 = math.tanh %5 : vector<8x128xf32>
    %7 = arith.truncf %6 : vector<8x128xf32> to vector<8x128xbf16>
    %c0_5 = arith.constant 0 : index
    %c0_6 = arith.constant 0 : index
    %8 = vector.load %arg6[%c0_5, %c0_6] : memref<128x512xbf16, #tpu.memory_space<vmem>>, vector<128x512xbf16>
    %cst_7 = arith.constant dense<0.000000e+00> : vector<8x512xf32>
    %9 = tpu.matmul %7, %8, %cst_7 {dimension_numbers = #tpu.dot_dimension_numbers<[1], [0], [0], [1], [0, 0, 1, 1], [], []>} : vector<8x128xbf16>, vector<128x512xbf16>, vector<8x512xf32> -> vector<8x512xf32>
    %c0_8 = arith.constant 0 : index
    %c0_9 = arith.constant 0 : index
    %10 = vector.load %arg3[%c0_8, %c0_9] : memref<8x1xi32, #tpu.memory_space<vmem>>, vector<8x1xi32>
    %11 = tpu.iota {dimensions = array<i32: 1>} : vector<8x24xi32>
    %12 = vector.broadcast %10 : vector<8x1xi32> to vector<8x24xi32>
    %13 = arith.cmpi eq, %12, %11 : vector<8x24xi32>
    %14 = arith.extui %13 : vector<8x24xi1> to vector<8x24xi32>
    %15 = arith.sitofp %14 : vector<8x24xi32> to vector<8x24xf32>
    %16 = arith.truncf %15 : vector<8x24xf32> to vector<8x24xbf16>
    %c0_10 = arith.constant 0 : index
    %c0_11 = arith.constant 0 : index
    %17 = vector.load %arg7[%c0_10, %c0_11] : memref<24x512xbf16, #tpu.memory_space<vmem>>, vector<24x512xbf16>
    %cst_12 = arith.constant dense<0.000000e+00> : vector<8x512xf32>
    %18 = tpu.matmul %16, %17, %cst_12 {dimension_numbers = #tpu.dot_dimension_numbers<[1], [0], [0], [1], [0, 0, 1, 1], [], []>} : vector<8x24xbf16>, vector<24x512xbf16>, vector<8x512xf32> -> vector<8x512xf32>
    %19 = arith.addf %9, %18 : vector<8x512xf32>
    %20 = arith.truncf %19 : vector<8x512xf32> to vector<8x512xbf16>
    %c0_13 = arith.constant 0 : index
    %c0_14 = arith.constant 0 : index
    %21 = vector.load %arg8[%c0_13, %c0_14] : memref<8x512xbf16, #tpu.memory_space<vmem>>, vector<8x512xbf16>
    tpu.vector_store %arg8[%c0_13, %c0_14], %20 {strides = array<i32>} : memref<8x512xbf16, #tpu.memory_space<vmem>>, vector<8x512xbf16>,
    return
  }
  func.func @transform_0(%arg0: i32, %arg1: i32) -> (i32, i32) {
    %c0_i32 = arith.constant 0 : i32
    %c0_i32_0 = arith.constant 0 : i32
    return %arg1, %c0_i32 : i32, i32
  }
  func.func @transform_1(%arg0: i32, %arg1: i32) -> (i32, i32) {
    %c0_i32 = arith.constant 0 : i32
    %c0_i32_0 = arith.constant 0 : i32
    return %arg1, %c0_i32 : i32, i32
  }
  func.func @transform_2(%arg0: i32, %arg1: i32) -> (i32, i32) {
    %c0_i32 = arith.constant 0 : i32
    %c0_i32_0 = arith.constant 0 : i32
    %c0_i32_1 = arith.constant 0 : i32
    return %c0_i32, %c0_i32_0 : i32, i32
  }
  func.func @transform_3(%arg0: i32, %arg1: i32) -> (i32, i32) {
    %c0_i32 = arith.constant 0 : i32
    %c0_i32_0 = arith.constant 0 : i32
    %c0_i32_1 = arith.constant 0 : i32
    return %c0_i32, %c0_i32_0 : i32, i32
  }
  func.func @transform_4(%arg0: i32, %arg1: i32) -> (i32, i32) {
    %c0_i32 = arith.constant 0 : i32
    %c0_i32_0 = arith.constant 0 : i32
    return %c0_i32, %arg0 : i32, i32
  }
  func.func @transform_5(%arg0: i32, %arg1: i32) -> (i32, i32) {
    %c0_i32 = arith.constant 0 : i32
    %c0_i32_0 = arith.constant 0 : i32
    return %c0_i32, %arg0 : i32, i32
  }
  func.func @transform_6(%arg0: i32, %arg1: i32) -> (i32, i32) {
    %c0_i32 = arith.constant 0 : i32
    return %arg1, %arg0 : i32, i32
  }
}

</mosaic_0001>

<bundles_post_ra>
// kernel: tpu_custom_call.1
= control target key start
LH: loop header
LB: loop body
LE: loop exit
PB: predicated region body
PF: predicated region fallthrough
CT: control target
= control target key end

     0   :  { %11 = vsyncpa [#allocation3], 0  ;;  %s1028_s0 = inlined_call_operand.vmem [shape: bf16[8,128], index: 0, kind: input, shape index: {}]   ;;  %s1029_s1 = inlined_call_operand.vmem [shape: s32[8,1], index: 1, kind: input, shape index: {}]   ;;  %s1030_s2 = inlined_call_operand.hbm [shape: bf16[128,128], index: 2, kind: input, shape index: {}]   ;;  %s1031_s3 = inlined_call_operand.vmem [shape: f32[1,128], index: 3, kind: input, shape index: {}]   ;;  %s1032_s4 = inlined_call_operand.hbm [shape: bf16[128,512], index: 4, kind: input, shape index: {}]   ;;  %s1033_s5 = inlined_call_operand.hbm [shape: bf16[24,512], index: 5, kind: input, shape index: {}]   ;;  %s1034_s6 = inlined_call_operand.hbm [shape: bf16[8,512], index: 6, kind: output, shape index: {}]  }
   0x1   :  { %12 = vsyncpa [#allocation6], 0 }
   0x2   :  { %13 = vsyncpa [#allocation4], 0  ;;  %s900_s21 = smov [#allocation5]   ;;  %s806_s25 = scalar_lea.hbm %s1032_s4, 4096 }
   0x3   :  { %s37_s22 = sshll.u32 %s900_s21, 4  ;;  %p807_p0 = scmp.ne.s32.totalorder %s1032_s4, %s806_s25  ;;  %s38_s22 = int_to_ptr.vmem [resolvable:$true] %s37_s22 }
   0x4   :  { %p810_p1 = scmp.lt.u32.totalorder %s806_s25, %s1032_s4 }
   0x6   :  { %p812_p2 = pnand %p810_p1, %p807_p0 }
   0x8   :  { %815 = shalt.err (!%p812_p2)
}
   0x9   :  { %s816_s30 = scalar_lea.vmem %s38_s22, 4096  ;;  %p821_p4 = scmp.lt.s32.totalorder %s38_s22, %s38_s22 }
   0xa   :  { %p817_p3 = scmp.ne.s32.totalorder %s38_s22, %s816_s30  ;;  %p822_p5 = scmp.lt.s32.totalorder %s816_s30, %s816_s30 }
   0xc   :  { %p823_p6 = por %p822_p5, %p821_p4 }
   0xe   :  { %p824_p7 = pnand %p823_p6, %p817_p3 }
  0x10   :  { %827 = shalt.err (!%p824_p7)
}
  0x11   :  { %s901_s7 = smov 256   ;;  %s902_s8 = smov 16  }
  0x12   :  { %43 = dma.hbm_to_vmem [thread:$0]  %s1032_s4, 4096, %s38_s22, [#allocation6], %s901_s7, %s901_s7, %s902_s8  }
  0x13   :  { %s903_s11 = smov [#allocation2]   ;;  %s828_s15 = scalar_lea.hbm %s1030_s2, 1024 }
  0x14   :  { %s23_s12 = sshll.u32 %s903_s11, 4  ;;  %p829_p8 = scmp.ne.s32.totalorder %s1030_s2, %s828_s15  ;;  %s24_s12 = int_to_ptr.vmem [resolvable:$true] %s23_s12 }
  0x15   :  { %p832_p9 = scmp.lt.u32.totalorder %s828_s15, %s1030_s2 }
  0x17   :  { %p834_p10 = pnand %p832_p9, %p829_p8 }
  0x19   :  { %837 = shalt.err (!%p834_p10)
}
  0x1a   :  { %s838_s20 = scalar_lea.vmem %s24_s12, 1024  ;;  %p843_p12 = scmp.lt.s32.totalorder %s24_s12, %s24_s12 }
  0x1b   :  { %p839_p11 = scmp.ne.s32.totalorder %s24_s12, %s838_s20  ;;  %p844_p13 = scmp.lt.s32.totalorder %s838_s20, %s838_s20 }
  0x1d   :  { %p845_p0 = por %p844_p13, %p843_p12 }
  0x1f   :  { %p846_p1 = pnand %p845_p0, %p839_p11 }
  0x21   :  { %849 = shalt.err (!%p846_p1)
}
  0x22   :  { %s904_s4 = smov 64   ;;  %s905_s21 = smov 4  }
  0x23   :  { %29 = dma.hbm_to_vmem [thread:$0]  %s1030_s2, 1024, %s24_s12, [#allocation3], %s904_s4, %s904_s4, %s905_s21  }
  0x24   :  { %s906_s24 = smov [#allocation7]   ;;  %s850_s28 = scalar_lea.hbm %s1033_s5, 768 }
  0x25   :  { %s49_s25 = sshll.u32 %s906_s24, 4  ;;  %p851_p2 = scmp.ne.s32.totalorder %s1033_s5, %s850_s28  ;;  %s50_s25 = int_to_ptr.vmem [resolvable:$true] %s49_s25 }
  0x26   :  { %p854_p3 = scmp.lt.u32.totalorder %s850_s28, %s1033_s5 }
  0x28   :  { %p856_p4 = pnand %p854_p3, %p851_p2 }
  0x2a   :  { %859 = shalt.err (!%p856_p4)
}
  0x2b   :  { %s860_s11 = scalar_lea.vmem %s50_s25, 768  ;;  %p865_p6 = scmp.lt.s32.totalorder %s50_s25, %s50_s25 }
  0x2c   :  { %p861_p5 = scmp.ne.s32.totalorder %s50_s25, %s860_s11  ;;  %p866_p7 = scmp.lt.s32.totalorder %s860_s11, %s860_s11 }
  0x2e   :  { %p867_p8 = por %p866_p7, %p865_p6 }
  0x30   :  { %p868_p9 = pnand %p867_p8, %p861_p5 }
  0x32   :  { %871 = shalt.err (!%p868_p9)
}
  0x33   :  { %55 = dma.hbm_to_vmem [thread:$0]  %s1033_s5, 768, %s50_s25, [#allocation6], %s901_s7, %s901_s7, %s902_s8  }
  0x34   :  { %894 = dma.done.wait [#allocation3], 1024  }
  0x35   :  { %895 = vsyncadd [#allocation3], 4294966272 }
  0x36   :  { %896 = dma.done.wait [#allocation6], 4864  }
  0x37   :  { %897 = vsyncadd [#allocation6], 4294962432  ;;  %v907_v0 = vmov 0.0   ;;  %vm908_vm0 = vmmov 0   ;;  %v909_v1 = vmov 0   ;;  %v738_v2 = vld [vmem:[#allocation2] sm:$0xff]   ;;  %v213_v35 = vlaneseq }
  0x38   :  { %700 = vmatprep.subr.bf16.mxu0 %v907_v0  ;;  %716 = vmatprep.mubr.msk.bf16.mxu0 %vm908_vm0, %v907_v0  ;;  %v739_v3 = vld [vmem:[#allocation2 + $0x8] sm:$0xff]   ;;  %v740_v4 = vld [vmem:[#allocation2 + $0x10] sm:$0xff]   ;;  %v741_v5 = vld [vmem:[#allocation2 + $0x18] sm:$0xff]   ;;  %vm262_vm1 = vcmask 1043456   ;;  %vm258_vm3 = vcmask 195584  }
  0x39   :  { %737 = vset.pattern.permute.xlu0 %v909_v1  ;;  %307 = vmatprep.mubr.bf16.mxu1 %v909_v1  ;;  %v212_v6 = vld [vmem:[%s1029_s1] sm:$0xff]  ;;  %v753_v12 = vld [vmem:[#allocation7 + $0xc] ss:$16 sps:$4 sm:$0xff]   ;;  %v744_v16 = vld [vmem:[#allocation2 + $0x30] sm:$0xff]   ;;  %v214_v36 = vand.u32 127, %v213_v35 }
  0x3a   :  { %701 = vmatpush3.bf16.msra.mxu0 %v738_v2  ;;  %216 = vperm.xlu0 %737, %v212_v6   ;;  %v746_v7 = vld [vmem:[#allocation7 + $0x4] ss:$16 sps:$4 sm:$0xff]   ;;  %v748_v8 = vld [vmem:[#allocation7] ss:$16 sps:$4 sm:$0xff]   ;;  %v743_v15 = vld [vmem:[#allocation2 + $0x28] sm:$0xff]  }
  0x3b   :  { %702 = vmatprep.subr.bf16.mxu0 %v907_v0  ;;  %275 = vmatprep.subr.bf16.mxu1 %v746_v7  ;;  %v226_v9 = vld [vmem:[#allocation7 + $0x20] sm:$0xff]  ;;  %v745_v17 = vld [vmem:[#allocation2 + $0x38] sm:$0xff]   ;;  %v227_v38 = vld [vmem:[#allocation7 + $0x28] sm:$0xff] }
  0x3c   :  { %276 = vmatpush1.bf16.msra.mxu1 %v748_v8  ;;  %v648_v10 = vcombine.high %v226_v9, %v226_v9  ;;  %v647_v11 = vcombine.low %v226_v9, %v226_v9  ;;  %v742_v13 = vld [vmem:[#allocation2 + $0x20] sm:$0xff]   ;;  %v751_v40 = vld [vmem:[#allocation7 + $0x8] ss:$16 sps:$4 sm:$0xff]   ;;  %v650_v42 = vcombine.high %v227_v38, %v227_v38  ;;  %v649_v43 = vcombine.low %v227_v38, %v227_v38  ;;  %v761_v45 = vld [vmem:[#allocation5 + $0xc] ss:$16 sps:$4 sm:$0xff]  }
  0x3d   :  { %v758_v18 = vld [vmem:[#allocation5 + $0x4] ss:$16 sps:$4 sm:$0xff]   ;;  %v66_v19 = vld [vmem:[%s1028_s0] sm:$0xf]  ;;  %v759_v46 = vld [vmem:[#allocation5 + $0x8] ss:$16 sps:$4 sm:$0xff]  }
  0x3e   :  { %703 = vmatpush3.bf16.msra.mxu0 %v739_v3  ;;  %651 = vmatprep.subr.msk.bf16.mxu1 %vm262_vm1, %v648_v10  ;;  %v264_v14 = vsel %vm262_vm1, %v647_v11, 0  ;;  %v756_v20 = vld [vmem:[#allocation5] ss:$16 sps:$4 sm:$0xff]   ;;  %v764_v21 = vld [vmem:[#allocation5 + $0x24] ss:$16 sps:$4 sm:$0xff]   ;;  %v270_v44 = vsel %vm262_vm1, %v649_v43, 0 }
  0x3f   :  { %704 = vmatprep.subr.bf16.mxu0 %v907_v0  ;;  %v762_v22 = vld [vmem:[#allocation5 + $0x20] ss:$16 sps:$4 sm:$0xff]   ;;  %v770_v23 = vld [vmem:[#allocation5 + $0x44] ss:$16 sps:$4 sm:$0xff]   ;;  %v767_v47 = vld [vmem:[#allocation5 + $0x2c] ss:$16 sps:$4 sm:$0xff]  }
  0x40   :  { %278 = vmatpush1.bf16.msra.mxu1 %v264_v14  ;;  %v768_v24 = vld [vmem:[#allocation5 + $0x40] ss:$16 sps:$4 sm:$0xff]   ;;  %v776_v25 = vld [vmem:[#allocation5 + $0x64] ss:$16 sps:$4 sm:$0xff]   ;;  %v765_v48 = vld [vmem:[#allocation5 + $0x28] ss:$16 sps:$4 sm:$0xff]  }
  0x41   :  { %316 = vmatprep.subr.bf16.mxu1 %v753_v12  ;;  %v774_v26 = vld [vmem:[#allocation5 + $0x60] ss:$16 sps:$4 sm:$0xff]   ;;  %v782_v27 = vld [vmem:[#allocation5 + $0x84] ss:$16 sps:$4 sm:$0xff]   ;;  %v773_v49 = vld [vmem:[#allocation5 + $0x4c] ss:$16 sps:$4 sm:$0xff]  }
  0x42   :  { %705 = vmatpush3.bf16.msra.mxu0 %v740_v4  ;;  %v780_v28 = vld [vmem:[#allocation5 + $0x80] ss:$16 sps:$4 sm:$0xff]   ;;  %v788_v29 = vld [vmem:[#allocation5 + $0xa4] ss:$16 sps:$4 sm:$0xff]   ;;  %v771_v50 = vld [vmem:[#allocation5 + $0x48] ss:$16 sps:$4 sm:$0xff]  }
  0x43   :  { %706 = vmatprep.subr.bf16.mxu0 %v907_v0  ;;  %v786_v30 = vld [vmem:[#allocation5 + $0xa0] ss:$16 sps:$4 sm:$0xff]   ;;  %v794_v31 = vld [vmem:[#allocation5 + $0xc4] ss:$16 sps:$4 sm:$0xff]   ;;  %v779_v51 = vld [vmem:[#allocation5 + $0x6c] ss:$16 sps:$4 sm:$0xff]  }
  0x44   :  { %v792_v32 = vld [vmem:[#allocation5 + $0xc0] ss:$16 sps:$4 sm:$0xff]   ;;  %v800_v33 = vld [vmem:[#allocation5 + $0xe4] ss:$16 sps:$4 sm:$0xff]   ;;  %v777_v52 = vld [vmem:[#allocation5 + $0x68] ss:$16 sps:$4 sm:$0xff]  }
  0x45   :  { %v798_v34 = vld [vmem:[#allocation5 + $0xe0] ss:$16 sps:$4 sm:$0xff]   ;;  %v785_v53 = vld [vmem:[#allocation5 + $0x8c] ss:$16 sps:$4 sm:$0xff]   ;;  %v783_v54 = vld [vmem:[#allocation5 + $0x88] ss:$16 sps:$4 sm:$0xff]  }
  0x46   :  { %707 = vmatpush3.bf16.msra.mxu0 %v741_v5  ;;  %v791_v55 = vld [vmem:[#allocation5 + $0xac] ss:$16 sps:$4 sm:$0xff]   ;;  %v789_v56 = vld [vmem:[#allocation5 + $0xa8] ss:$16 sps:$4 sm:$0xff]   ;;  %v633_v61 = vld [vmem:[%s1031_s3] ss:$0 sm:$0xff] }
  0x47   :  { %708 = vmatprep.subr.bf16.mxu0 %v907_v0  ;;  %v797_v57 = vld [vmem:[#allocation5 + $0xcc] ss:$16 sps:$4 sm:$0xff]   ;;  %v795_v58 = vld [vmem:[#allocation5 + $0xc8] ss:$16 sps:$4 sm:$0xff]   ;;  %s910_s3 = smov [#allocation8]  }
  0x48   :  { %v803_v59 = vld [vmem:[#allocation5 + $0xec] ss:$16 sps:$4 sm:$0xff]   ;;  %v801_v60 = vld [vmem:[#allocation5 + $0xe8] ss:$16 sps:$4 sm:$0xff]   ;;  %s623_s14 = sshll.u32 %s910_s3, 4  ;;  %s624_s14 = int_to_ptr.vmem [resolvable:$true] %s623_s14 }
  0x49   :  { %s872_s15 = scalar_lea.vmem %s624_s14, 256  ;;  %p877_p11 = scmp.lt.s32.totalorder %s624_s14, %s624_s14 }
  0x4a   :  { %709 = vmatpush3.bf16.msra.mxu0 %v742_v13  ;;  %p873_p10 = scmp.ne.s32.totalorder %s624_s14, %s872_s15  ;;  %p878_p12 = scmp.lt.s32.totalorder %s872_s15, %s872_s15 }
  0x4b   :  { %710 = vmatprep.subr.bf16.mxu0 %v907_v0 }
  0x4c   :  { %p879_p13 = por %p878_p12, %p877_p11 }
  0x4e   :  { %711 = vmatpush3.bf16.msra.mxu0 %v743_v15  ;;  %p880_p0 = pnand %p879_p13, %p873_p10 }
  0x4f   :  { %712 = vmatprep.subr.bf16.mxu0 %v907_v0 }
  0x52   :  { %713 = vmatpush3.bf16.msra.mxu0 %v744_v16 }
  0x53   :  { %714 = vmatprep.subr.bf16.mxu0 %v907_v0 }
  0x56   :  { %715 = vmatpush3.bf16.msra.mxu0 %v745_v17 }
  0x57   :  { %517 = vmatprep.subr.bf16.mxu0 %v758_v18 }
  0x59   :  { %717 = vmatmul.mubr.bf16.vlgmr.msra.gmra.mrb[0].mxu0 %v66_v19 }
  0x5a   :  { %518 = vmatpush1.bf16.msra.mxu0 %v756_v20  ;;  %549 = vmatprep.mubr.bf16.mxu0 %v909_v1 }
  0x5b   :  { %519 = vmatprep.subr.bf16.mxu0 %v764_v21 }
  0x5e   :  { %520 = vmatpush1.bf16.msra.mxu0 %v762_v22 }
  0x5f   :  { %521 = vmatprep.subr.bf16.mxu0 %v770_v23 }
  0x62   :  { %522 = vmatpush1.bf16.msra.mxu0 %v768_v24 }
  0x63   :  { %523 = vmatprep.subr.bf16.mxu0 %v776_v25 }
  0x66   :  { %524 = vmatpush1.bf16.msra.mxu0 %v774_v26 }
  0x67   :  { %525 = vmatprep.subr.bf16.mxu0 %v782_v27 }
  0x6a   :  { %526 = vmatpush1.bf16.msra.mxu0 %v780_v28 }
  0x6b   :  { %527 = vmatprep.subr.bf16.mxu0 %v788_v29 }
  0x6e   :  { %528 = vmatpush1.bf16.msra.mxu0 %v786_v30 }
  0x6f   :  { %529 = vmatprep.subr.bf16.mxu0 %v794_v31 }
  0x72   :  { %530 = vmatpush1.bf16.msra.mxu0 %v792_v32 }
  0x73   :  { %531 = vmatprep.subr.bf16.mxu0 %v800_v33 }
  0x76   :  { %532 = vmatpush1.bf16.msra.mxu0 %v798_v34 }
  0xb9   :  { %v217_v37 = vpop.permute.xlu0 %216 }
  0xba   :  { %vm218_vm2 = vcmp.eq.s32.totalorder %v217_v37, %v214_v36 }
  0xbb   :  { %v642_v39 = vsel %vm218_vm2, 1.0, %v907_v0 }
  0xbc   :  { %v221_v41 = vpack.c.bf16 %v642_v39, %v642_v39 }
  0xbe   :  { %652 = vmatmul.mubr.msk.bf16.vlgmr.msra.gmra.mrb[0].mxu1 %vm258_vm3, %v221_v41 }
  0xbf   :  { %317 = vmatpush1.bf16.msra.mxu1 %v751_v40  ;;  %348 = vmatprep.mubr.bf16.mxu1 %v909_v1 }
  0xc0   :  { %653 = vmatprep.subr.msk.bf16.mxu1 %vm262_vm1, %v650_v42 }
  0xc3   :  { %319 = vmatpush1.bf16.msra.mxu1 %v270_v44 }
  0xc4   :  { %558 = vmatprep.subr.bf16.mxu1 %v761_v45 }
  0xc6   :  { %654 = vmatmul.mubr.msk.bf16.vlgmr.msra.gmra.mrb[4].mxu1 %vm258_vm3, %v221_v41 }
  0xc7   :  { %559 = vmatpush1.bf16.msra.mxu1 %v759_v46  ;;  %590 = vmatprep.mubr.bf16.mxu1 %v909_v1 }
  0xc8   :  { %560 = vmatprep.subr.bf16.mxu1 %v767_v47 }
  0xcb   :  { %561 = vmatpush1.bf16.msra.mxu1 %v765_v48 }
  0xcc   :  { %562 = vmatprep.subr.bf16.mxu1 %v773_v49 }
  0xcf   :  { %563 = vmatpush1.bf16.msra.mxu1 %v771_v50 }
  0xd0   :  { %564 = vmatprep.subr.bf16.mxu1 %v779_v51 }
  0xd3   :  { %565 = vmatpush1.bf16.msra.mxu1 %v777_v52 }
  0xd4   :  { %566 = vmatprep.subr.bf16.mxu1 %v785_v53 }
  0xd7   :  { %567 = vmatpush1.bf16.msra.mxu1 %v783_v54 }
  0xd8   :  { %568 = vmatprep.subr.bf16.mxu1 %v791_v55 }
  0xdb   :  { %569 = vmatpush1.bf16.msra.mxu1 %v789_v56 }
  0xdc   :  { %570 = vmatprep.subr.bf16.mxu1 %v797_v57 }
  0xdf   :  { %571 = vmatpush1.bf16.msra.mxu1 %v795_v58 }
  0xe0   :  { %572 = vmatprep.subr.bf16.mxu1 %v803_v59 }
  0xe3   :  { %573 = vmatpush1.bf16.msra.mxu1 %v801_v60 }
 0x12c   :  { %v172_v62 = vpop.f32.mrb[0].mxu0 }
 0x12d   :  { %v173_v63 = vadd.f32 %v633_v61, %v172_v62  ;;  %v718_v0 = vpop.f32.mrb[1].mxu0 }
 0x12e   :  { %v175_v1 = vpop.f32.mrb[2].mxu0 }
 0x12f   :  { %804 = vtanh.f32 %v173_v63  ;;  %v719_v2 = vpop.f32.mrb[3].mxu0 }
 0x139   :  { %v805_v3 = vpop.eup %804 }
 0x13a   :  { %v179_v4 = vpack.c.bf16 %v805_v3, %v805_v3 }
 0x13c   :  { %550 = vmatmul.mubr.bf16.vlgmr.msra.gmra.mrb[4].mxu0 %v179_v4  ;;  %591 = vmatmul.mubr.bf16.vlgmr.msra.gmra.mrb[4].mxu1 %v179_v4 }
 0x191   :  { %v309_v5 = vpop.f32.mrb[0].mxu1 }
 0x192   :  { %v311_v6 = vpop.f32.mrb[1].mxu1 }
 0x193   :  { %v313_v7 = vpop.f32.mrb[2].mxu1 }
 0x194   :  { %v314_v8 = vpop.f32.mrb[3].mxu1 }
 0x20f   :  { %v551_v9 = vpop.f32.mrb[4].mxu0  ;;  %v592_v10 = vpop.f32.mrb[4].mxu1 }
 0x210   :  { %v552_v11 = vadd.f32 %v551_v9, %v309_v5  ;;  %v553_v12 = vpop.f32.mrb[5].mxu0  ;;  %v594_v13 = vpop.f32.mrb[5].mxu1 }
 0x211   :  { %v554_v14 = vadd.f32 %v553_v12, %v311_v6  ;;  %v690_v15 = vpack.c.bf16 %v594_v13, %v592_v10  ;;  %v555_v16 = vpop.f32.mrb[6].mxu0  ;;  %v596_v17 = vpop.f32.mrb[6].mxu1 }
 0x212   :  { %v556_v18 = vpop.f32.mrb[7].mxu0  ;;  %v597_v19 = vpop.f32.mrb[7].mxu1 }
 0x213   :  { %v689_v20 = vpack.c.bf16 %v554_v14, %v552_v11  ;;  %616 = vst [vmem:[#allocation8 + $0x8] sm:$0xff] %v690_v15 }
 0x215   :  { %615 = vst [vmem:[#allocation8] sm:$0xff] %v689_v20 }
 0x216   :  { %883 = shalt.err (!%p880_p0)
}
 0x217   :  { %s884_s18 = scalar_lea.hbm %s1034_s6, 256 }
 0x218   :  { %p885_p1 = scmp.ne.s32.totalorder %s1034_s6, %s884_s18  ;;  %p888_p2 = scmp.lt.u32.totalorder %s884_s18, %s1034_s6 }
 0x21a   :  { %p890_p3 = pnand %p888_p2, %p885_p1 }
 0x21c   :  { %893 = shalt.err (!%p890_p3)
}
 0x21d   :  { %626 = dma.vmem_to_hbm [thread:$0]  %s624_s14, 256, %s1034_s6, [#allocation4]  }
 0x21e   :  { %898 = dma.done.wait [#allocation4], 256  }
 0x21f   :  { %899 = vsyncadd [#allocation4], 4294967040 }
 0x220   :  { %630 = vsyncpa [#allocation3], 1 }
 0x221   :  { %631 = vsyncpa [#allocation6], 1 }
 0x222   :  { %632 = vsyncpa [#allocation4], 1 }

</bundles_post_ra>
